<compile_context>
chip_gen: v6e
topology: v6e:2x2x1
jax: 0.10.0
libtpu: 0.0.40
codegen_flags: <defaults>
</compile_context>

<pallas_src>
import jax
import jax.numpy as jnp
from jax.experimental import pallas as pl
from jax.experimental.pallas import tpu as pltpu


# Lane widths to try for the copy slab (largest multiple of 128 that divides
# the word count wins -> wide, unmasked, DMA-friendly rectangles).
_LANE_CANDIDATES = (4096, 2048, 1024, 512, 256, 128)

# ~2 MiB per block: with one input + one output, double-buffered, that is
# ~8 MiB of VMEM -> safe under the default scoped limit on v5e/v6e/v7x while
# still being large enough to sit on the measured copy-efficiency plateau.
_TARGET_BLOCK_BYTES = 2 * 1024 * 1024


def _copy_kernel(x_ref, o_ref):
    # Identity copy of the current lane-dense (row_block, C) block.
    o_ref[...] = x_ref[...]


def _copy_words(words):
    """HBM->HBM identity copy of a 1-D array of 32-bit words via Pallas."""
    n_words = words.shape[0]
    word_dtype = words.dtype
    word_bytes = jnp.dtype(word_dtype).itemsize  # 4

    # Pick the widest lane-dense layout that divides the word count; otherwise
    # pad up to a multiple of 128 (pad region is copied then sliced away).
    lane = next((c for c in _LANE_CANDIDATES if n_words % c == 0), 128)
    pad = (-n_words) % lane
    if pad:
        words = jnp.pad(words, (0, pad))
    rows = words.shape[0] // lane
    slab = jnp.reshape(words, (rows, lane))

    # Row-block sizing: target ~_TARGET_BLOCK_BYTES per block, multiple of 8
    # sublanes, never collapse to a single whole-array block for large inputs.
    target_rows = max(8, (_TARGET_BLOCK_BYTES // (word_bytes * lane)) // 8 * 8)
    if rows <= 8:
        row_block = rows                      # block == full dim (allowed)
    else:
        row_block = min(target_rows, max(8, (rows // 8) * 8))
    grid = (pl.cdiv(rows, row_block),)        # ragged last block handled by Pallas

    out_slab = pl.pallas_call(
        _copy_kernel,
        out_shape=jax.ShapeDtypeStruct((rows, lane), word_dtype),
        grid_spec=pltpu.PrefetchScalarGridSpec(
            num_scalar_prefetch=0,
            grid=grid,
            in_specs=[pl.BlockSpec((row_block, lane), lambda i: (i, 0))],
            out_specs=pl.BlockSpec((row_block, lane), lambda i: (i, 0)),
        ),
        compiler_params=pltpu.CompilerParams(
            dimension_semantics=("parallel",),
        ),
        # Identity copy: let the output alias the input HBM buffer.
        input_output_aliases={0: 0},
    )(slab)

    out_words = jnp.reshape(out_slab, (-1,))
    if pad:
        out_words = out_words[:n_words]
    return out_words


def reshape_module(x, shape):
    """Equivalent of Reshape(shape).forward(x) == x.view(-1, shape, 1)."""
    total = x.size
    assert total % shape == 0, "total element count must be divisible by `shape`"
    n_rows = total // shape

    flat = jnp.reshape(x, (total,))

    # Pack sub-32-bit dtypes (bf16 / int8 / fp8) into 32-bit words so the copy
    # is always full-vreg regardless of element dtype.
    itemsize = jnp.dtype(x.dtype).itemsize
    ratio = (4 // itemsize) if itemsize < 4 else 1
    if ratio > 1 and total % ratio == 0:
        words = jax.lax.bitcast_convert_type(
            jnp.reshape(flat, (total // ratio, ratio)), jnp.uint32)
    else:
        ratio = 1
        words = flat

    out_words = _copy_words(words)

    if ratio > 1:
        out_flat = jnp.reshape(
            jax.lax.bitcast_convert_type(out_words, x.dtype), (total,))
    else:
        out_flat = out_words

    # Zero-cost view bookkeeping, matching x.view(-1, shape, 1).
    return jnp.reshape(out_flat, (n_rows, shape, 1))


if __name__ == "__main__":
    key = jax.random.PRNGKey(0)
    target_shape = 32  # the `args` passed to Reshape.__init__

    # Small NCHW-style input; total elements = 2*4*16*16 = 2048.
    x = jax.random.normal(key, (2, 4, 16, 16), dtype=jnp.float32)
    out = jax.block_until_ready(reshape_module(x, target_shape))
    ref = jnp.reshape(x, (-1, target_shape, 1))
    assert out.shape == ref.shape == (2048 // target_shape, target_shape, 1)
    assert jnp.array_equal(out, ref)

    # Exercise the packed (sub-32-bit) path with bf16.
    x_bf16 = x.astype(jnp.bfloat16)
    out_bf16 = jax.block_until_ready(reshape_module(x_bf16, target_shape))
    ref_bf16 = jnp.reshape(x_bf16, (-1, target_shape, 1))
    assert out_bf16.shape == ref_bf16.shape
    assert jnp.array_equal(out_bf16, ref_bf16)

    print("KERNEL_OK")
</pallas_src>

<mosaic_0001>
module attributes {stable_mosaic.version = 11 : i64} {
  func.func @_copy_kernel(%arg0: i32, %arg1: memref<1x2048xf32, #tpu.memory_space<vmem>>, %arg2: memref<1x2048xf32, #tpu.memory_space<vmem>>) attributes {dimension_semantics = [#tpu.dimension_semantics<parallel>], iteration_bounds = array<i64: 1>, scalar_prefetch = 0 : i64, scratch_operands = 0 : i64, tpu.core_type = #tpu.core_type<tc>, window_params = [{transform_indices = @transform_0, window_bounds = array<i64: 1, 2048>}, {transform_indices = @transform_1, window_bounds = array<i64: 1, 2048>}]} {
    %c0 = arith.constant 0 : index
    %c0_0 = arith.constant 0 : index
    %0 = vector.load %arg1[%c0, %c0_0] : memref<1x2048xf32, #tpu.memory_space<vmem>>, vector<1x2048xf32>
    %c0_1 = arith.constant 0 : index
    %c0_2 = arith.constant 0 : index
    %1 = vector.load %arg2[%c0_1, %c0_2] : memref<1x2048xf32, #tpu.memory_space<vmem>>, vector<1x2048xf32>
    tpu.vector_store %arg2[%c0_1, %c0_2], %0 {strides = array<i32>} : memref<1x2048xf32, #tpu.memory_space<vmem>>, vector<1x2048xf32>,
    return
  }
  func.func @transform_0(%arg0: i32) -> (i32, i32) {
    %c0_i32 = arith.constant 0 : i32
    %c0_i32_0 = arith.constant 0 : i32
    return %arg0, %c0_i32 : i32, i32
  }
  func.func @transform_1(%arg0: i32) -> (i32, i32) {
    %c0_i32 = arith.constant 0 : i32
    %c0_i32_0 = arith.constant 0 : i32
    return %arg0, %c0_i32 : i32, i32
  }
}

</mosaic_0001>

<bundles_post_ra>
// kernel: tpu_custom_call.1
= control target key start
LH: loop header
LB: loop body
LE: loop exit
PB: predicated region body
PF: predicated region fallthrough
CT: control target
= control target key end

     0   :  { %6 = vsyncpa [#allocation3], 0  ;;  %s104_s0 = inlined_call_operand.hbm [shape: f32[1,2048], index: 0, kind: input, shape index: {}, may-alias: {0,1}]   ;;  %s105_s1 = inlined_call_operand.hbm [shape: f32[1,2048], index: 1, kind: output, shape index: {}, may-alias: {0,1}]  }
   0x1   :  { %7 = vsyncpa [#allocation4], 0  ;;  %s86_s6 = smov [#allocation2]  }
   0x2   :  { %s14_s7 = sshll.u32 %s86_s6, 4  ;;  %s15_s7 = int_to_ptr.vmem [resolvable:$true] %s14_s7 }
   0x3   :  { %s50_s8 = scalar_lea.vmem %s15_s7, 256  ;;  %p55_p1 = scmp.lt.s32.totalorder %s15_s7, %s15_s7 }
   0x4   :  { %p51_p0 = scmp.ne.s32.totalorder %s15_s7, %s50_s8  ;;  %p56_p2 = scmp.lt.s32.totalorder %s50_s8, %s50_s8 }
   0x6   :  { %p57_p3 = por %p56_p2, %p55_p1 }
   0x8   :  { %p58_p4 = pnand %p57_p3, %p51_p0 }
   0xa   :  { %61 = shalt.err (!%p58_p4)
}
   0xb   :  { %17 = dma.hbm_to_vmem [thread:$0]  %s104_s0, 256, %s15_s7, [#allocation3]  }
   0xc   :  { %82 = dma.done.wait [#allocation3], 256  }
   0xd   :  { %83 = vsyncadd [#allocation3], 4294967040  ;;  %s87_s11 = smov [#allocation5]   ;;  %v21_v0 = vld [vmem:[#allocation2] sm:$0xff]  ;;  %v22_v1 = vld [vmem:[#allocation2 + $0x8] sm:$0xff] }
   0xe   :  { %s31_s12 = sshll.u32 %s87_s11, 4  ;;  %23 = vst [vmem:[#allocation5] sm:$0xff] %v21_v0  ;;  %24 = vst [vmem:[#allocation5 + $0x8] sm:$0xff] %v22_v1  ;;  %s32_s12 = int_to_ptr.vmem [resolvable:$true] %s31_s12 }
   0xf   :  { %s62_s13 = scalar_lea.vmem %s32_s12, 256  ;;  %p67_p6 = scmp.lt.s32.totalorder %s32_s12, %s32_s12 }
  0x10   :  { %p63_p5 = scmp.ne.s32.totalorder %s32_s12, %s62_s13  ;;  %p68_p7 = scmp.lt.s32.totalorder %s62_s13, %s62_s13 }
  0x12   :  { %p69_p8 = por %p68_p7, %p67_p6 }
  0x14   :  { %p70_p9 = pnand %p69_p8, %p63_p5 }
  0x16   :  { %73 = shalt.err (!%p70_p9)
}
  0x17   :  { %34 = dma.vmem_to_hbm [thread:$0]  %s32_s12, 256, %s105_s1, [#allocation4]  }
  0x18   :  { %84 = dma.done.wait [#allocation4], 256  }
  0x19   :  { %85 = vsyncadd [#allocation4], 4294967040 }
  0x1a   :  { %38 = vsyncpa [#allocation3], 1 }
  0x1b   :  { %39 = vsyncpa [#allocation4], 1 }

</bundles_post_ra>
